<compile_context>
chip_gen: v7x
topology: tpu7x:2x2x1
jax: 0.10.0
libtpu: 0.0.40
codegen_flags: <defaults>
</compile_context>

<pallas_src>
import functools

import jax
import jax.numpy as jnp
from jax.experimental import pallas as pl
from jax.experimental.pallas import tpu as pltpu


# ----------------------------- Pallas kernel -------------------------------

def _fused_mlp_kernel(x_ref, w_ref, b_ref, o_ref):
    """Fused MLP forward on one batch tile.

    x_ref : (tb, input_dim)
    w_ref : (n_hidden + 1, H, H)   BN-folded hidden weights + padded output W
    b_ref : (n_hidden + 1, H)      BN-folded hidden biases  + padded output b
    o_ref : (tb, output_features)
    """
    n_layers = w_ref.shape[0]          # n_hidden + 1
    d_in = x_ref.shape[-1]
    n_out = o_ref.shape[-1]

    # First hidden layer: only the first d_in rows of the padded weight matter.
    h = x_ref[...]
    h = jnp.dot(h, w_ref[0, :d_in, :], preferred_element_type=jnp.float32)
    h = jnp.maximum(h + b_ref[0:1, :], 0.0)

    # Remaining hidden layers (BN already folded into w/b; Dropout = identity).
    for li in range(1, n_layers - 1):
        h = jnp.dot(h, w_ref[li], preferred_element_type=jnp.float32)
        h = jnp.maximum(h + b_ref[li:li + 1, :], 0.0)

    # Output layer (columns zero-padded to H); store only the real columns.
    y = jnp.dot(h, w_ref[n_layers - 1], preferred_element_type=jnp.float32)
    y = y + b_ref[n_layers - 1:n_layers, :]
    o_ref[...] = y[:, :n_out].astype(o_ref.dtype)


# ------------------------------- wrapper ------------------------------------

def fused_mlp(x, w_slab, b_slab, n_out, *, block_b=None):
    """Run the fused MLP.  block_b=None -> single shot (everything in VMEM)."""
    B, d_in = x.shape
    n_layers, H, _ = w_slab.shape
    out_shape = jax.ShapeDtypeStruct((B, n_out), x.dtype)

    if block_b is None or block_b >= B:
        # Small batch: no grid, no pipeline machinery, 3 input DMAs total.
        vmem = pl.BlockSpec(memory_space=pltpu.MemorySpace.VMEM)
        return pl.pallas_call(
            _fused_mlp_kernel,
            out_shape=out_shape,
            in_specs=[vmem, vmem, vmem],
            out_specs=pl.BlockSpec(memory_space=pltpu.MemorySpace.VMEM),
        )(x, w_slab, b_slab)

    # Large batch: tile the batch, parallel axis (both TCs on v7x); params keep
    # a constant block index so they are DMA'd once and stay resident.
    assert B % block_b == 0, (B, block_b)
    return pl.pallas_call(
        _fused_mlp_kernel,
        out_shape=out_shape,
        grid=(B // block_b,),
        in_specs=[
            pl.BlockSpec((block_b, d_in), lambda i: (i, 0)),
            pl.BlockSpec((n_layers, H, H), lambda i: (0, 0, 0)),
            pl.BlockSpec((n_layers, H), lambda i: (0, 0)),
        ],
        out_specs=pl.BlockSpec((block_b, n_out), lambda i: (i, 0)),
        compiler_params=pltpu.CompilerParams(
            dimension_semantics=("parallel",)),
    )(x, w_slab, b_slab)


@functools.partial(jax.jit, static_argnames=("n_out", "block_b"))
def integrated_forward(x, w_slab, b_slab, *, n_out, block_b=None):
    # Kernel output IS the final result — no post-kernel slice op.
    return fused_mlp(x, w_slab, b_slab, n_out, block_b=block_b)


# --------------------------- model construction -----------------------------

def init_params(key, input_dim, num_hidden_layers, hidden_units, output_features):
    """Deterministic synthetic parameters matching the PyTorch module shapes.

    Linear weights are stored pre-transposed as (in, out) so the kernel does
    y = x @ W + b (== PyTorch x @ W.T + b).  Returns raw (unfolded) params.
    """
    params = []
    dims = [input_dim] + [hidden_units] * num_hidden_layers
    for li in range(num_hidden_layers):
        key, k_w, k_b, k_g, k_be, k_m, k_v = jax.random.split(key, 7)
        d_in, d_out = dims[li], dims[li + 1]
        params.append(dict(
            w=jax.random.normal(k_w, (d_in, d_out), jnp.float32) * 0.05,
            b=jax.random.normal(k_b, (1, d_out), jnp.float32) * 0.05,
            gamma=1.0 + 0.1 * jax.random.normal(k_g, (1, d_out), jnp.float32),
            beta=0.1 * jax.random.normal(k_be, (1, d_out), jnp.float32),
            run_mean=0.1 * jax.random.normal(k_m, (1, d_out), jnp.float32),
            run_var=1.0 + 0.1 * jax.random.uniform(k_v, (1, d_out), jnp.float32),
        ))
    key, k_w, k_b = jax.random.split(key, 3)
    w_out = jax.random.normal(k_w, (hidden_units, output_features), jnp.float32) * 0.05
    b_out = jax.random.normal(k_b, (1, output_features), jnp.float32) * 0.05
    return params, (w_out, b_out)


def fold_params(hidden_params, out_params, eps=1e-5, dtype=jnp.float32):
    """Fold eval-mode BN into the Linear weights and pack everything into two
    DMA slabs: w_slab (L+1, H, H) and b_slab (L+1, H).

    Runs ONCE at load time — keep it out of the per-inference hot path.
    """
    L = len(hidden_params)
    H = hidden_params[0]["w"].shape[1]
    w_slab = jnp.zeros((L + 1, H, H), dtype)
    b_slab = jnp.zeros((L + 1, H), dtype)
    for li, p in enumerate(hidden_params):
        scale = p["gamma"] / jnp.sqrt(p["run_var"] + eps)      # (1, H)
        shift = p["beta"] - p["run_mean"] * scale               # (1, H)
        w = (p["w"] * scale).astype(dtype)                      # (d_in, H)
        b = (p["b"] * scale + shift).astype(dtype)              # (1, H)
        d_in = w.shape[0]
        w_slab = w_slab.at[li, :d_in, :].set(w)                 # zero-pad rows
        b_slab = b_slab.at[li, :].set(b[0])
    w_out, b_out = out_params
    n_out = w_out.shape[1]
    w_slab = w_slab.at[L, :, :n_out].set(w_out.astype(dtype))   # zero-pad cols
    b_slab = b_slab.at[L, :n_out].set(b_out[0].astype(dtype))
    return w_slab, b_slab


def reference_forward(x, hidden_params, out_params, eps=1e-5):
    """Pure-JAX reference with UNFOLDED params: Linear -> BN(eval) -> ReLU."""
    h = x
    for p in hidden_params:
        h = h @ p["w"] + p["b"]
        h = (h - p["run_mean"]) / jnp.sqrt(p["run_var"] + eps) * p["gamma"] + p["beta"]
        h = jnp.maximum(h, 0.0)
    w_out, b_out = out_params
    return h @ w_out + b_out


# --------------------------------- main --------------------------------------

if __name__ == "__main__":
    input_dim = 32
    hidden_units = 128
    num_hidden_layers = 2
    output_features = 2
    batch = 16  # multiple of 8 (sublane); single-shot VMEM path

    key = jax.random.PRNGKey(0)
    key, k_x = jax.random.split(key)
    x = jax.random.normal(k_x, (batch, input_dim), jnp.float32)

    hidden_params, out_params = init_params(
        key, input_dim, num_hidden_layers, hidden_units, output_features)

    # One-time (load-time) BN folding + slab packing.
    w_slab, b_slab = fold_params(hidden_params, out_params)
    w_slab, b_slab = jax.block_until_ready((w_slab, b_slab))

    # Small batch: no-grid, fully VMEM-resident kernel.
    y = integrated_forward(x, w_slab, b_slab, n_out=output_features)
    y = jax.block_until_ready(y)
    y_ref = reference_forward(x, hidden_params, out_params)
    assert y.shape == (batch, output_features), y.shape
    assert jnp.allclose(y, y_ref, atol=1e-4, rtol=1e-4), "mismatch vs reference"

    # Larger batch: batch-tiled parallel grid (fills MXU, both TCs on v7x).
    big_batch = 256
    xb = jax.random.normal(jax.random.PRNGKey(1), (big_batch, input_dim), jnp.float32)
    yb_tiled = integrated_forward(xb, w_slab, b_slab, n_out=output_features,
                                  block_b=128)
    yb_single = integrated_forward(xb, w_slab, b_slab, n_out=output_features)
    yb_tiled, yb_single = jax.block_until_ready((yb_tiled, yb_single))
    assert yb_tiled.shape == (big_batch, output_features), yb_tiled.shape
    assert jnp.allclose(yb_tiled, yb_single, atol=1e-5, rtol=1e-5), \
        "tiled path mismatch vs single-shot path"

    print("KERNEL_OK")
</pallas_src>

<mosaic_0001>
module attributes {stable_mosaic.version = 11 : i64} {
  func.func @_fused_mlp_kernel(%arg0: memref<16x32xf32, #tpu.memory_space<vmem>>, %arg1: memref<3x128x128xf32, #tpu.memory_space<vmem>>, %arg2: memref<3x128xf32, #tpu.memory_space<vmem>>, %arg3: memref<16x2xf32, #tpu.memory_space<vmem>>) attributes {dimension_semantics = [], scalar_prefetch = 0 : i64, scratch_operands = 0 : i64, tpu.core_type = #tpu.core_type<tc>} {
    %c0 = arith.constant 0 : index
    %c0_0 = arith.constant 0 : index
    %0 = vector.load %arg0[%c0, %c0_0] : memref<16x32xf32, #tpu.memory_space<vmem>>, vector<16x32xf32>
    %c0_1 = arith.constant 0 : index
    %c0_2 = arith.constant 0 : index
    %c0_3 = arith.constant 0 : index
    %1 = vector.load %arg1[%c0_1, %c0_2, %c0_3] : memref<3x128x128xf32, #tpu.memory_space<vmem>>, vector<1x32x128xf32>
    %2 = vector.shape_cast %1 : vector<1x32x128xf32> to vector<32x128xf32>
    %cst = arith.constant dense<0.000000e+00> : vector<16x128xf32>
    %3 = tpu.matmul %0, %2, %cst {dimension_numbers = #tpu.dot_dimension_numbers<[1], [0], [0], [1], [0, 0, 1, 1], [], []>} : vector<16x32xf32>, vector<32x128xf32>, vector<16x128xf32> -> vector<16x128xf32>
    %c0_4 = arith.constant 0 : index
    %c0_5 = arith.constant 0 : index
    %4 = vector.load %arg2[%c0_4, %c0_5] : memref<3x128xf32, #tpu.memory_space<vmem>>, vector<1x128xf32>
    %5 = vector.broadcast %4 : vector<1x128xf32> to vector<16x128xf32>
    %6 = arith.addf %3, %5 : vector<16x128xf32>
    %cst_6 = arith.constant 0.000000e+00 : f32
    %7 = vector.broadcast %cst_6 : f32 to vector<16x128xf32>
    %8 = arith.maximumf %6, %7 : vector<16x128xf32>
    %c1 = arith.constant 1 : index
    %c0_7 = arith.constant 0 : index
    %c0_8 = arith.constant 0 : index
    %9 = vector.load %arg1[%c1, %c0_7, %c0_8] : memref<3x128x128xf32, #tpu.memory_space<vmem>>, vector<1x128x128xf32>
    %10 = vector.shape_cast %9 : vector<1x128x128xf32> to vector<128x128xf32>
    %cst_9 = arith.constant dense<0.000000e+00> : vector<16x128xf32>
    %11 = tpu.matmul %8, %10, %cst_9 {dimension_numbers = #tpu.dot_dimension_numbers<[1], [0], [0], [1], [0, 0, 1, 1], [], []>} : vector<16x128xf32>, vector<128x128xf32>, vector<16x128xf32> -> vector<16x128xf32>
    %c1_10 = arith.constant 1 : index
    %c0_11 = arith.constant 0 : index
    %12 = vector.load %arg2[%c1_10, %c0_11] : memref<3x128xf32, #tpu.memory_space<vmem>>, vector<1x128xf32>
    %13 = vector.broadcast %12 : vector<1x128xf32> to vector<16x128xf32>
    %14 = arith.addf %11, %13 : vector<16x128xf32>
    %cst_12 = arith.constant 0.000000e+00 : f32
    %15 = vector.broadcast %cst_12 : f32 to vector<16x128xf32>
    %16 = arith.maximumf %14, %15 : vector<16x128xf32>
    %c2 = arith.constant 2 : index
    %c0_13 = arith.constant 0 : index
    %c0_14 = arith.constant 0 : index
    %17 = vector.load %arg1[%c2, %c0_13, %c0_14] : memref<3x128x128xf32, #tpu.memory_space<vmem>>, vector<1x128x128xf32>
    %18 = vector.shape_cast %17 : vector<1x128x128xf32> to vector<128x128xf32>
    %cst_15 = arith.constant dense<0.000000e+00> : vector<16x128xf32>
    %19 = tpu.matmul %16, %18, %cst_15 {dimension_numbers = #tpu.dot_dimension_numbers<[1], [0], [0], [1], [0, 0, 1, 1], [], []>} : vector<16x128xf32>, vector<128x128xf32>, vector<16x128xf32> -> vector<16x128xf32>
    %c2_16 = arith.constant 2 : index
    %c0_17 = arith.constant 0 : index
    %20 = vector.load %arg2[%c2_16, %c0_17] : memref<3x128xf32, #tpu.memory_space<vmem>>, vector<1x128xf32>
    %21 = vector.broadcast %20 : vector<1x128xf32> to vector<16x128xf32>
    %22 = arith.addf %19, %21 : vector<16x128xf32>
    %23 = vector.extract_strided_slice %22 {offsets = [0, 0], sizes = [16, 2], strides = [1, 1]} : vector<16x128xf32> to vector<16x2xf32>
    %c0_18 = arith.constant 0 : index
    %c0_19 = arith.constant 0 : index
    %24 = vector.load %arg3[%c0_18, %c0_19] : memref<16x2xf32, #tpu.memory_space<vmem>>, vector<16x2xf32>
    tpu.vector_store %arg3[%c0_18, %c0_19], %23 {strides = array<i32>} : memref<16x2xf32, #tpu.memory_space<vmem>>, vector<16x2xf32>,
    return
  }
}

</mosaic_0001>

<bundles_post_ra>
// kernel: integrated_forward.1
= control target key start
LH: loop header
LB: loop body
LE: loop exit
PB: predicated region body
PF: predicated region fallthrough
CT: control target
= control target key end

     0   :  { %8 = vsyncpa [#allocation3], 0  ;;  %s659_s0 = inlined_call_operand.hbm [shape: f32[16,32], index: 0, kind: input, shape index: {}]   ;;  %s660_s1 = inlined_call_operand.hbm [shape: f32[3,128,128], index: 1, kind: input, shape index: {}]   ;;  %s661_s2 = inlined_call_operand.vmem [shape: f32[3,128], index: 2, kind: input, shape index: {}]   ;;  %s662_s3 = inlined_call_operand.vmem [shape: f32[16,2], index: 3, kind: output, shape index: {}]  }
   0x1   :  { %9 = vsyncpa [#allocation5], 0  ;;  %s594_s12 = smov [#allocation2]   ;;  %s546_s16 = scalar_lea.hbm %s659_s0, 256 }
   0x2   :  { %s15_s13 = sshll.u32 %s594_s12, 4  ;;  %p547_p0 = scmp.ne.s32.totalorder %s659_s0, %s546_s16  ;;  %s16_s13 = int_to_ptr.vmem [resolvable:$true] %s15_s13 }
   0x3   :  { %p550_p1 = scmp.lt.u32.totalorder %s546_s16, %s659_s0 }
   0x5   :  { %p552_p2 = pnand %p550_p1, %p547_p0 }
   0x7   :  { %555 = shalt.err (!%p552_p2)
}
   0x8   :  { %s556_s21 = scalar_lea.vmem %s16_s13, 256  ;;  %p561_p4 = scmp.lt.s32.totalorder %s16_s13, %s16_s13 }
   0x9   :  { %p557_p3 = scmp.ne.s32.totalorder %s16_s13, %s556_s21  ;;  %p562_p5 = scmp.lt.s32.totalorder %s556_s21, %s556_s21 }
   0xb   :  { %p563_p6 = por %p562_p5, %p561_p4 }
   0xd   :  { %p564_p7 = pnand %p563_p6, %p557_p3 }
   0xf   :  { %567 = shalt.err (!%p564_p7)
}
  0x10   :  { %s595_s22 = smov 128   ;;  %s596_s23 = smov 8  }
  0x11   :  { %21 = dma.hbm_to_vmem [thread:$0]  %s659_s0, 256, %s16_s13, [#allocation3], %s595_s22, %s595_s22, %s596_s23  }
  0x12   :  { %s597_s26 = smov [#allocation4]   ;;  %s568_s30 = scalar_lea.hbm %s660_s1, 6144 }
  0x13   :  { %s27_s27 = sshll.u32 %s597_s26, 4  ;;  %p569_p8 = scmp.ne.s32.totalorder %s660_s1, %s568_s30  ;;  %s28_s27 = int_to_ptr.vmem [resolvable:$true] %s27_s27 }
  0x14   :  { %p572_p9 = scmp.lt.u32.totalorder %s568_s30, %s660_s1 }
  0x16   :  { %p574_p10 = pnand %p572_p9, %p569_p8 }
  0x18   :  { %577 = shalt.err (!%p574_p10)
}
  0x19   :  { %s578_s8 = scalar_lea.vmem %s28_s27, 6144  ;;  %p583_p12 = scmp.lt.s32.totalorder %s28_s27, %s28_s27 }
  0x1a   :  { %p579_p11 = scmp.ne.s32.totalorder %s28_s27, %s578_s8  ;;  %p584_p13 = scmp.lt.s32.totalorder %s578_s8, %s578_s8 }
  0x1c   :  { %p585_p0 = por %p584_p13, %p583_p12 }
  0x1e   :  { %p586_p1 = pnand %p585_p0, %p579_p11 }
  0x20   :  { %589 = shalt.err (!%p586_p1)
}
  0x21   :  { %33 = dma.hbm_to_vmem [thread:$0]  %s660_s1, 6144, %s28_s27, [#allocation5], %s595_s22, %s595_s22, %s596_s23  }
  0x22   :  { %590 = dma.done.wait [#allocation3], 256  }
  0x23   :  { %591 = vsyncadd [#allocation3], 4294967040 }
  0x24   :  { %592 = dma.done.wait [#allocation5], 6144  }
  0x25   :  { %593 = vsyncadd [#allocation5], 4294961152  ;;  %vm53_vm0 = vcmask 261120   ;;  %v44_v0 = vld [vmem:[#allocation4] sm:$0xff]  ;;  %v45_v1 = vld [vmem:[#allocation4 + $0x8] sm:$0xff]  ;;  %vm333_vm1 = vcmask 15360  }
  0x26   :  { %v46_v2 = vld [vmem:[#allocation4 + $0x10] sm:$0xff]  ;;  %v470_v3 = vpack.c.bf16 %v45_v1, %v44_v0  ;;  %v47_v4 = vld [vmem:[#allocation4 + $0x18] sm:$0xff]  ;;  %v138_v7 = vld [vmem:[#allocation4 + $0x80] sm:$0xff] }
  0x27   :  { %v42_v5 = vld [vmem:[#allocation2] sm:$0xff]  ;;  %v474_v6 = vpack.c.bf16 %v47_v4, %v46_v2  ;;  %v139_v8 = vld [vmem:[#allocation4 + $0x88] sm:$0xff]  ;;  %v141_v11 = vld [vmem:[#allocation4 + $0x98] sm:$0xff] }
  0x28   :  { %397 = vmatprep.mubr.msk.f32.mxu0 %vm53_vm0, %v42_v5  ;;  %v140_v9 = vld [vmem:[#allocation4 + $0x90] sm:$0xff]  ;;  %471 = vmatprep.subr.bf16.mxu0 %v470_v3  ;;  %v478_v10 = vpack.c.bf16 %v139_v8, %v138_v7  ;;  %v142_v13 = vld [vmem:[#allocation4 + $0xa0] sm:$0xff]  ;;  %v143_v14 = vld [vmem:[#allocation4 + $0xa8] sm:$0xff] }
  0x29   :  { %473 = vmatpush3.bf16.msra.mxu0 %v470_v3  ;;  %v482_v12 = vpack.c.bf16 %v141_v11, %v140_v9  ;;  %v486_v15 = vpack.c.bf16 %v143_v14, %v142_v13  ;;  %v43_v16 = vld [vmem:[#allocation2 + $0x8] sm:$0xff]  ;;  %v144_v17 = vld [vmem:[#allocation4 + $0xb0] sm:$0xff]  ;;  %v146_v20 = vld [vmem:[#allocation4 + $0xc0] sm:$0xff] }
  0x2a   :  { %475 = vmatprep.subr.bf16.mxu0 %v474_v6  ;;  %479 = vmatprep.subr.bf16.mxu1 %v478_v10  ;;  %v145_v18 = vld [vmem:[#allocation4 + $0xb8] sm:$0xff]  ;;  %v147_v21 = vld [vmem:[#allocation4 + $0xc8] sm:$0xff]  ;;  %v148_v23 = vld [vmem:[#allocation4 + $0xd0] sm:$0xff] }
  0x2b   :  { %481 = vmatpush3.bf16.msra.mxu1 %v478_v10  ;;  %v490_v19 = vpack.c.bf16 %v145_v18, %v144_v17  ;;  %v494_v22 = vpack.c.bf16 %v147_v21, %v146_v20  ;;  %v149_v24 = vld [vmem:[#allocation4 + $0xd8] sm:$0xff]  ;;  %v150_v26 = vld [vmem:[#allocation4 + $0xe0] sm:$0xff]  ;;  %v151_v27 = vld [vmem:[#allocation4 + $0xe8] sm:$0xff] }
  0x2c   :  { %483 = vmatprep.subr.bf16.mxu1 %v482_v12  ;;  %v498_v25 = vpack.c.bf16 %v149_v24, %v148_v23  ;;  %v502_v28 = vpack.c.bf16 %v151_v27, %v150_v26  ;;  %v152_v29 = vld [vmem:[#allocation4 + $0xf0] sm:$0xff]  ;;  %v153_v30 = vld [vmem:[#allocation4 + $0xf8] sm:$0xff]  ;;  %v237_v32 = vld [vmem:[#allocation4 + $0x100] sm:$0xff] }
  0x2d   :  { %477 = vmatpush3.bf16.msra.mxu0 %v474_v6  ;;  %v506_v31 = vpack.c.bf16 %v153_v30, %v152_v29  ;;  %v238_v33 = vld [vmem:[#allocation4 + $0x108] sm:$0xff]  ;;  %v239_v34 = vld [vmem:[#allocation4 + $0x110] sm:$0xff]  ;;  %v240_v36 = vld [vmem:[#allocation4 + $0x118] sm:$0xff] }
  0x2e   :  { %v510_v35 = vpack.c.bf16 %v238_v33, %v237_v32  ;;  %v514_v37 = vpack.c.bf16 %v240_v36, %v239_v34  ;;  %v241_v38 = vld [vmem:[#allocation4 + $0x120] sm:$0xff]  ;;  %v242_v39 = vld [vmem:[#allocation4 + $0x128] sm:$0xff]  ;;  %v243_v41 = vld [vmem:[#allocation4 + $0x130] sm:$0xff] }
  0x2f   :  { %485 = vmatpush3.bf16.msra.mxu1 %v482_v12  ;;  %v518_v40 = vpack.c.bf16 %v242_v39, %v241_v38  ;;  %v244_v42 = vld [vmem:[#allocation4 + $0x138] sm:$0xff]  ;;  %v245_v44 = vld [vmem:[#allocation4 + $0x140] sm:$0xff]  ;;  %v246_v45 = vld [vmem:[#allocation4 + $0x148] sm:$0xff] }
  0x30   :  { %398 = vmatmul.mubr.msk.f32.vlgmr.msra.gmra.mrb[0].mxu0 %vm53_vm0, %v43_v16  ;;  %487 = vmatprep.subr.bf16.mxu1 %v486_v15  ;;  %v522_v43 = vpack.c.bf16 %v244_v42, %v243_v41  ;;  %v526_v46 = vpack.c.bf16 %v246_v45, %v245_v44  ;;  %v247_v47 = vld [vmem:[#allocation4 + $0x150] sm:$0xff]  ;;  %v248_v48 = vld [vmem:[#allocation4 + $0x158] sm:$0xff]  ;;  %v249_v50 = vld [vmem:[#allocation4 + $0x160] sm:$0xff] }
  0x31   :  { %511 = vmatprep.subr.bf16.mxu0 %v510_v35  ;;  %v530_v49 = vpack.c.bf16 %v248_v48, %v247_v47  ;;  %v250_v51 = vld [vmem:[#allocation4 + $0x168] sm:$0xff]  ;;  %v342_v53 = vld [vmem:[%s661_s2] ss:$0 sm:$0xff]  ;;  %v251_v60 = vld [vmem:[#allocation4 + $0x170] sm:$0xff] }
  0x32   :  { %513 = vmatpush3.bf16.msra.mxu0 %v510_v35  ;;  %v534_v52 = vpack.c.bf16 %v250_v51, %v249_v50  ;;  %v252_v61 = vld [vmem:[#allocation4 + $0x178] sm:$0xff]  ;;  %v345_v63 = vld [vmem:[%s661_s2 + $0x1] ss:$0 sm:$0xff]  ;;  %v346_v6 = vld [vmem:[%s661_s2 + $0x2] ss:$0 sm:$0xff] }
  0x33   :  { %489 = vmatpush3.bf16.msra.mxu1 %v486_v15  ;;  %515 = vmatprep.subr.bf16.mxu0 %v514_v37  ;;  %v538_v62 = vpack.c.bf16 %v252_v61, %v251_v60 }
  0x34   :  { %491 = vmatprep.subr.bf16.mxu1 %v490_v19 }
  0x36   :  { %517 = vmatpush3.bf16.msra.mxu0 %v514_v37 }
  0x37   :  { %493 = vmatpush3.bf16.msra.mxu1 %v490_v19  ;;  %519 = vmatprep.subr.bf16.mxu0 %v518_v40 }
  0x38   :  { %495 = vmatprep.subr.bf16.mxu1 %v494_v22 }
  0x3a   :  { %521 = vmatpush3.bf16.msra.mxu0 %v518_v40 }
  0x3b   :  { %497 = vmatpush3.bf16.msra.mxu1 %v494_v22  ;;  %523 = vmatprep.subr.bf16.mxu0 %v522_v43 }
  0x3c   :  { %499 = vmatprep.subr.bf16.mxu1 %v498_v25 }
  0x3e   :  { %525 = vmatpush3.bf16.msra.mxu0 %v522_v43 }
  0x3f   :  { %501 = vmatpush3.bf16.msra.mxu1 %v498_v25  ;;  %527 = vmatprep.subr.bf16.mxu0 %v526_v46 }
  0x40   :  { %503 = vmatprep.subr.bf16.mxu1 %v502_v28 }
  0x42   :  { %529 = vmatpush3.bf16.msra.mxu0 %v526_v46 }
  0x43   :  { %505 = vmatpush3.bf16.msra.mxu1 %v502_v28  ;;  %531 = vmatprep.subr.bf16.mxu0 %v530_v49 }
  0x44   :  { %507 = vmatprep.subr.bf16.mxu1 %v506_v31 }
  0x46   :  { %533 = vmatpush3.bf16.msra.mxu0 %v530_v49 }
  0x47   :  { %509 = vmatpush3.bf16.msra.mxu1 %v506_v31  ;;  %535 = vmatprep.subr.bf16.mxu0 %v534_v52 }
  0x4a   :  { %537 = vmatpush3.bf16.msra.mxu0 %v534_v52 }
  0x4b   :  { %539 = vmatprep.subr.bf16.mxu0 %v538_v62 }
  0x4e   :  { %541 = vmatpush3.bf16.msra.mxu0 %v538_v62 }
 0x103   :  { %v399_v54 = vpop.f32.mrb[0].mxu0 }
 0x104   :  { %v132_v55 = vadd.f32 %v399_v54, %v342_v53  ;;  %v126_v56 = vpop.f32.mrb[1].mxu0 }
 0x105   :  { %v127_v57 = vadd.f32 %v342_v53, %v126_v56 }
 0x106   :  { %v136_v59 = vmax.f32 %v132_v55, 0.0 }
 0x107   :  { %v135_v58 = vmax.f32 %v127_v57, 0.0 }
 0x109   :  { %432 = vmatprep.mubr.f32.mxu1 %v135_v58 }
 0x10a   :  { %433 = vmatmul.mubr.f32.vlgmr.msra.gmra.mrb[0].mxu1 %v136_v59 }
 0x1dd   :  { %v434_v0 = vpop.f32.mrb[0].mxu1 }
 0x1de   :  { %v231_v1 = vadd.f32 %v434_v0, %v345_v63  ;;  %v225_v2 = vpop.f32.mrb[1].mxu1 }
 0x1df   :  { %v226_v3 = vadd.f32 %v345_v63, %v225_v2 }
 0x1e0   :  { %v235_v5 = vmax.f32 %v231_v1, 0.0 }
 0x1e1   :  { %v234_v4 = vmax.f32 %v226_v3, 0.0 }
 0x1e3   :  { %467 = vmatprep.mubr.f32.mxu0 %v234_v4 }
 0x1e4   :  { %468 = vmatmul.mubr.f32.vlgmr.msra.gmra.mrb[2].mxu0 %v235_v5 }
 0x2b7   :  { %v469_v7 = vpop.f32.mrb[2].mxu0 }
 0x2b8   :  { %v330_v8 = vadd.f32 %v469_v7, %v346_v6  ;;  %v324_v9 = vpop.f32.mrb[3].mxu0 }
 0x2b9   :  { %v325_v10 = vadd.f32 %v346_v6, %v324_v9 }
 0x2ba   :  { %335 = vst.msk [vmem:[%s662_s3 + $0x8] sm:$0xff] %vm333_vm1, %v330_v8 }
 0x2bb   :  { %334 = vst.msk [vmem:[%s662_s3] sm:$0xff] %vm333_vm1, %v325_v10 }
 0x2bc   :  { %340 = vsyncpa [#allocation3], 1 }
 0x2bd   :  { %341 = vsyncpa [#allocation5], 1 }

</bundles_post_ra>
